<compile_context>
chip_gen: v7x
topology: tpu7x:2x2x1
jax: 0.10.0
libtpu: 0.0.40
codegen_flags: <defaults>
</compile_context>

<pallas_src>
import functools
from typing import NamedTuple

import jax
import jax.numpy as jnp
from jax.experimental import pallas as pl
from jax.experimental.pallas import tpu as pltpu


def _round_up(x: int, m: int) -> int:
    return (x + m - 1) // m * m


class FFNPlan(NamedTuple):
    tm_max: int   # max row tile (multiple of 8)
    th: int       # hidden tile (multiple of 128)
    e_pad: int    # n_embed padded to multiple of 128
    h_pad: int    # hidden padded to multiple of th


def plan_ffn(n_embed: int, hidden: int, *, tm_max: int = 256, th_max: int = 512,
             vmem_budget_bytes: int = 24 * 1024 * 1024,
             weight_bytes: int = 2) -> FFNPlan:
    """Pick row/hidden tiles that fit the VMEM budget on all TPU generations."""
    e_pad = _round_up(n_embed, 128)
    th = min(th_max, _round_up(hidden, 128))
    tm = tm_max

    def vmem_use(tm_, th_):
        return (2 * tm_ * e_pad * weight_bytes          # x tile (bf16, 2 bufs)
                + 2 * e_pad * (2 * th_) * weight_bytes  # fused [w1|w3] tile (2 bufs)
                + 2 * th_ * e_pad * weight_bytes        # w2 tile (2 bufs)
                + tm_ * e_pad * 4                       # f32 accumulator scratch
                + 2 * tm_ * e_pad * 4)                  # out tile (worst-case f32, 2 bufs)

    while vmem_use(tm, th) > vmem_budget_bytes and th > 128:
        th = max(128, (th // 2) // 128 * 128)
    while vmem_use(tm, th) > vmem_budget_bytes and tm > 8:
        tm = max(8, tm // 2)

    h_pad = _round_up(hidden, th)
    return FFNPlan(tm_max=tm, th=th, e_pad=e_pad, h_pad=h_pad)


def prepare_ffn_weights(w1, w2, w3, plan: FFNPlan, compute_dtype=jnp.bfloat16):
    """One-time weight prep (outside the per-call jit):
    transpose from PyTorch (out, in) layout, zero-pad to lane-dense shapes,
    cast to bf16, and fuse w1/w3 per hidden tile as [... | w1_j | w3_j | ...]."""
    hidden, n_embed = w1.shape
    e_pad, h_pad, th = plan.e_pad, plan.h_pad, plan.th

    def pad_proj(w):  # (hidden, n_embed) -> (e_pad, h_pad), transposed + padded
        wt = w.T.astype(compute_dtype)
        return jnp.pad(wt, ((0, e_pad - n_embed), (0, h_pad - hidden)))

    w1t = pad_proj(w1)
    w3t = pad_proj(w3)
    nh = h_pad // th
    # Block j of the fused weight holds [w1 tile j | w3 tile j] -> one MXU dot.
    w13 = jnp.concatenate(
        [w1t.reshape(e_pad, nh, th), w3t.reshape(e_pad, nh, th)], axis=-1
    ).reshape(e_pad, 2 * h_pad)

    w2t = jnp.pad(w2.T.astype(compute_dtype),
                  ((0, h_pad - hidden), (0, e_pad - n_embed)))
    return w13, w2t


def _ffn_kernel(x_ref, w13_ref, w2_ref, o_ref, acc_ref, *, th):
    # x_ref:   (tm, e_pad)      bf16
    # w13_ref: (e_pad, 2*th)    bf16   -> [w1 tile | w3 tile] for hidden tile j
    # w2_ref:  (th, e_pad)      bf16
    # o_ref:   (tm, e_pad)      x.dtype
    # acc_ref: (tm, e_pad)      f32 scratch accumulator (lives across j)
    j = pl.program_id(1)

    @pl.when(j == 0)
    def _init():
        acc_ref[...] = jnp.zeros_like(acc_ref)

    # Single fused projection for both w1 and w3 (one wide MXU matmul).
    h = jnp.dot(x_ref[...], w13_ref[...], preferred_element_type=jnp.float32)
    h1 = h[:, :th]
    h3 = h[:, th:]
    # SiLU gate in f32 (VPU/EUP); v5e has no bf16 VPU so f32 is the right choice.
    gated = (h1 * jax.nn.sigmoid(h1)) * h3
    # Down-projection: bf16 operands, f32 accumulation into the scratch.
    acc_ref[...] += jnp.dot(gated.astype(w2_ref.dtype), w2_ref[...],
                            preferred_element_type=jnp.float32)

    @pl.when(j == pl.num_programs(1) - 1)
    def _store():
        o_ref[...] = acc_ref[...].astype(o_ref.dtype)


@functools.partial(jax.jit, static_argnames=("plan", "compute_dtype"))
def feed_forward(x, w13, w2t, *, plan: FFNPlan, compute_dtype=jnp.bfloat16):
    """x: (..., n_embed). w13/w2t come from prepare_ffn_weights(). Returns the
    SwiGLU FFN output with the same shape/dtype as x (dropout = identity)."""
    orig_shape = x.shape
    n_embed = orig_shape[-1]
    x2d = x.reshape(-1, n_embed)
    m = x2d.shape[0]

    e_pad, h_pad, th = plan.e_pad, plan.h_pad, plan.th
    assert w13.shape == (e_pad, 2 * h_pad)
    assert w2t.shape == (h_pad, e_pad)

    # Row tile: as large as the plan allows, but never larger than needed.
    tm = min(plan.tm_max, _round_up(m, 8))
    m_pad = _round_up(m, tm)

    # Zero-pad rows and the embedding dim (lane-dense, no divisibility asserts).
    x_p = jnp.pad(x2d.astype(compute_dtype),
                  ((0, m_pad - m), (0, e_pad - n_embed)))

    grid = (m_pad // tm, h_pad // th)

    out = pl.pallas_call(
        functools.partial(_ffn_kernel, th=th),
        out_shape=jax.ShapeDtypeStruct((m_pad, e_pad), x.dtype),
        grid_spec=pltpu.PrefetchScalarGridSpec(
            num_scalar_prefetch=0,
            grid=grid,
            in_specs=[
                # x tile: constant across the hidden axis -> stays resident.
                pl.BlockSpec((tm, e_pad), lambda i, j: (i, 0)),
                # Fused [w1|w3] tile for hidden tile j.
                pl.BlockSpec((e_pad, 2 * th), lambda i, j: (0, j)),
                # w2 rows for hidden tile j.
                pl.BlockSpec((th, e_pad), lambda i, j: (j, 0)),
            ],
            out_specs=pl.BlockSpec((tm, e_pad), lambda i, j: (i, 0)),
            scratch_shapes=[pltpu.VMEM((tm, e_pad), jnp.float32)],
        ),
        compiler_params=pltpu.CompilerParams(
            # M axis parallel (v7x: 2 TCs/chip), hidden axis is the reduction.
            dimension_semantics=("parallel", "arbitrary"),
            # Explicit scoped-VMEM limit: raises v5e's 16 MiB default, stays
            # within v7x's 64 MiB physical VMEM.
            vmem_limit_bytes=32 * 1024 * 1024,
        ),
    )(x_p, w13, w2t)

    # Dropout: identity in eval mode.
    return out[:m, :n_embed].reshape(orig_shape)


def _reference(x, w1, w2, w3, compute_dtype=jnp.bfloat16):
    """Same math with the same operand dtypes (bf16 matmuls, f32 accumulation)."""
    cd = compute_dtype
    xc = x.astype(cd)
    h1 = jnp.dot(xc, w1.T.astype(cd), preferred_element_type=jnp.float32)
    h3 = jnp.dot(xc, w3.T.astype(cd), preferred_element_type=jnp.float32)
    gated = (h1 * jax.nn.sigmoid(h1)) * h3
    out = jnp.dot(gated.astype(cd), w2.T.astype(cd),
                  preferred_element_type=jnp.float32)
    return out.astype(x.dtype)


def _run_case(key, batch, seq, n_embed, hidden, **plan_kwargs):
    kx, k1, k2, k3 = jax.random.split(key, 4)
    x = jax.random.normal(kx, (batch, seq, n_embed), dtype=jnp.float32)
    # PyTorch nn.Linear weight layout: (out_features, in_features).
    b1 = 1.0 / (n_embed ** 0.5)
    b2 = 1.0 / (hidden ** 0.5)
    w1 = jax.random.uniform(k1, (hidden, n_embed), jnp.float32, -b1, b1)
    w2 = jax.random.uniform(k2, (n_embed, hidden), jnp.float32, -b2, b2)
    w3 = jax.random.uniform(k3, (hidden, n_embed), jnp.float32, -b1, b1)

    plan = plan_ffn(n_embed, hidden, **plan_kwargs)
    w13, w2t = prepare_ffn_weights(w1, w2, w3, plan)      # one-time prep
    out = feed_forward(x, w13, w2t, plan=plan)
    out = jax.block_until_ready(out)

    ref = _reference(x, w1, w2, w3)
    assert out.shape == x.shape and out.dtype == x.dtype
    assert jnp.allclose(out, ref, atol=1e-2, rtol=1e-2), "mismatch vs reference"


if __name__ == "__main__":
    key = jax.random.PRNGKey(0)
    k_a, k_b = jax.random.split(key)

    # Case 1: the toy GPT config (n_embed=32 -> hidden = int(2*4*32/3) = 85).
    # Exercises n_embed/hidden padding to 128 and small-M row tiling.
    _run_case(k_a, batch=2, seq=8, n_embed=32, hidden=int(2 * (4 * 32) / 3))

    # Case 2: ragged shapes + multi-tile grid (2 row tiles x 2 hidden tiles)
    # to exercise the f32 accumulator / pl.when store path and M padding.
    _run_case(k_b, batch=3, seq=20, n_embed=96, hidden=int(2 * (4 * 96) / 3),
              tm_max=32, th_max=128)

    print("KERNEL_OK")
</pallas_src>

<mosaic_0001>
module attributes {stable_mosaic.version = 11 : i64} {
  func.func @_ffn_kernel(%arg0: i32, %arg1: i32, %arg2: memref<16x128xbf16, #tpu.memory_space<vmem>>, %arg3: memref<128x256xbf16, #tpu.memory_space<vmem>>, %arg4: memref<128x128xbf16, #tpu.memory_space<vmem>>, %arg5: memref<16x128xf32, #tpu.memory_space<vmem>>, %arg6: memref<16x128xf32, #tpu.memory_space<vmem>>) attributes {dimension_semantics = [#tpu.dimension_semantics<parallel>, #tpu.dimension_semantics<arbitrary>], iteration_bounds = array<i64: 1, 1>, scalar_prefetch = 0 : i64, scratch_operands = 1 : i64, tpu.core_type = #tpu.core_type<tc>, window_params = [{transform_indices = @transform_0, window_bounds = array<i64: 16, 128>}, {transform_indices = @transform_1, window_bounds = array<i64: 128, 256>}, {transform_indices = @transform_2, window_bounds = array<i64: 128, 128>}, {transform_indices = @transform_3, window_bounds = array<i64: 16, 128>}]} {
    %c0_i32 = arith.constant 0 : i32
    %0 = arith.cmpi eq, %arg1, %c0_i32 : i32
    %1 = arith.extui %0 : i1 to i32
    %c0_i32_0 = arith.constant 0 : i32
    %2 = arith.cmpi ne, %1, %c0_i32_0 : i32
    scf.if %2 {
      %cst_14 = arith.constant 0.000000e+00 : f32
      %24 = vector.broadcast %cst_14 : f32 to vector<16x128xf32>
      %c0_15 = arith.constant 0 : index
      %c0_16 = arith.constant 0 : index
      %25 = vector.load %arg6[%c0_15, %c0_16] : memref<16x128xf32, #tpu.memory_space<vmem>>, vector<16x128xf32>
      tpu.vector_store %arg6[%c0_15, %c0_16], %24 {strides = array<i32>} : memref<16x128xf32, #tpu.memory_space<vmem>>, vector<16x128xf32>,
    } else {
    }
    %c0 = arith.constant 0 : index
    %c0_1 = arith.constant 0 : index
    %3 = vector.load %arg2[%c0, %c0_1] : memref<16x128xbf16, #tpu.memory_space<vmem>>, vector<16x128xbf16>
    %c0_2 = arith.constant 0 : index
    %c0_3 = arith.constant 0 : index
    %4 = vector.load %arg3[%c0_2, %c0_3] : memref<128x256xbf16, #tpu.memory_space<vmem>>, vector<128x256xbf16>
    %cst = arith.constant dense<0.000000e+00> : vector<16x256xf32>
    %5 = tpu.matmul %3, %4, %cst {dimension_numbers = #tpu.dot_dimension_numbers<[1], [0], [0], [1], [0, 0, 1, 1], [], []>} : vector<16x128xbf16>, vector<128x256xbf16>, vector<16x256xf32> -> vector<16x256xf32>
    %6 = vector.extract_strided_slice %5 {offsets = [0, 0], sizes = [16, 128], strides = [1, 1]} : vector<16x256xf32> to vector<16x128xf32>
    %7 = vector.extract_strided_slice %5 {offsets = [0, 128], sizes = [16, 128], strides = [1, 1]} : vector<16x256xf32> to vector<16x128xf32>
    %8 = arith.negf %6 : vector<16x128xf32>
    %9 = math.exp %8 : vector<16x128xf32>
    %cst_4 = arith.constant 1.000000e+00 : f32
    %10 = vector.broadcast %cst_4 : f32 to vector<16x128xf32>
    %11 = arith.addf %10, %9 : vector<16x128xf32>
    %12 = arith.divf %10, %11 : vector<16x128xf32>
    %13 = arith.mulf %6, %12 : vector<16x128xf32>
    %14 = arith.mulf %13, %7 : vector<16x128xf32>
    %c0_5 = arith.constant 0 : index
    %c0_6 = arith.constant 0 : index
    %15 = vector.load %arg6[%c0_5, %c0_6] : memref<16x128xf32, #tpu.memory_space<vmem>>, vector<16x128xf32>
    %16 = arith.truncf %14 : vector<16x128xf32> to vector<16x128xbf16>
    %c0_7 = arith.constant 0 : index
    %c0_8 = arith.constant 0 : index
    %17 = vector.load %arg4[%c0_7, %c0_8] : memref<128x128xbf16, #tpu.memory_space<vmem>>, vector<128x128xbf16>
    %cst_9 = arith.constant dense<0.000000e+00> : vector<16x128xf32>
    %18 = tpu.matmul %16, %17, %cst_9 {dimension_numbers = #tpu.dot_dimension_numbers<[1], [0], [0], [1], [0, 0, 1, 1], [], []>} : vector<16x128xbf16>, vector<128x128xbf16>, vector<16x128xf32> -> vector<16x128xf32>
    %19 = arith.addf %15, %18 : vector<16x128xf32>
    %c0_10 = arith.constant 0 : index
    %c0_11 = arith.constant 0 : index
    %20 = vector.load %arg6[%c0_10, %c0_11] : memref<16x128xf32, #tpu.memory_space<vmem>>, vector<16x128xf32>
    tpu.vector_store %arg6[%c0_10, %c0_11], %19 {strides = array<i32>} : memref<16x128xf32, #tpu.memory_space<vmem>>, vector<16x128xf32>,
    %c0_i32_12 = arith.constant 0 : i32
    %21 = arith.cmpi eq, %arg1, %c0_i32_12 : i32
    %22 = arith.extui %21 : i1 to i32
    %c0_i32_13 = arith.constant 0 : i32
    %23 = arith.cmpi ne, %22, %c0_i32_13 : i32
    scf.if %23 {
      %c0_14 = arith.constant 0 : index
      %c0_15 = arith.constant 0 : index
      %24 = vector.load %arg6[%c0_14, %c0_15] : memref<16x128xf32, #tpu.memory_space<vmem>>, vector<16x128xf32>
      %c0_16 = arith.constant 0 : index
      %c0_17 = arith.constant 0 : index
      %25 = vector.load %arg5[%c0_16, %c0_17] : memref<16x128xf32, #tpu.memory_space<vmem>>, vector<16x128xf32>
      tpu.vector_store %arg5[%c0_16, %c0_17], %24 {strides = array<i32>} : memref<16x128xf32, #tpu.memory_space<vmem>>, vector<16x128xf32>,
    } else {
    }
    return
  }
  func.func @transform_0(%arg0: i32, %arg1: i32) -> (i32, i32) {
    %c0_i32 = arith.constant 0 : i32
    %c0_i32_0 = arith.constant 0 : i32
    return %arg0, %c0_i32 : i32, i32
  }
  func.func @transform_1(%arg0: i32, %arg1: i32) -> (i32, i32) {
    %c0_i32 = arith.constant 0 : i32
    %c0_i32_0 = arith.constant 0 : i32
    return %c0_i32, %arg1 : i32, i32
  }
  func.func @transform_2(%arg0: i32, %arg1: i32) -> (i32, i32) {
    %c0_i32 = arith.constant 0 : i32
    %c0_i32_0 = arith.constant 0 : i32
    return %arg1, %c0_i32 : i32, i32
  }
  func.func @transform_3(%arg0: i32, %arg1: i32) -> (i32, i32) {
    %c0_i32 = arith.constant 0 : i32
    %c0_i32_0 = arith.constant 0 : i32
    return %arg0, %c0_i32 : i32, i32
  }
}

</mosaic_0001>

<bundles_post_ra>
// kernel: feed_forward.1
= control target key start
LH: loop header
LB: loop body
LE: loop exit
PB: predicated region body
PF: predicated region fallthrough
CT: control target
= control target key end

     0   :  { %8 = vsyncpa [#allocation4], 0  ;;  %s553_s0 = inlined_call_operand.vmem [shape: bf16[16,128], index: 0, kind: input, shape index: {}]   ;;  %s554_s1 = inlined_call_operand.hbm [shape: bf16[128,256], index: 1, kind: input, shape index: {}]   ;;  %s555_s2 = inlined_call_operand.hbm [shape: bf16[128,128], index: 2, kind: input, shape index: {}]   ;;  %s556_s3 = inlined_call_operand.vmem [shape: f32[16,128], index: 3, kind: output, shape index: {}]  }
   0x1   :  { %9 = vsyncpa [#allocation6], 0  ;;  %s491_s12 = smov [#allocation3]   ;;  %s443_s16 = scalar_lea.hbm %s554_s1, 2048 }
   0x2   :  { %s17_s13 = sshll.u32 %s491_s12, 4  ;;  %p444_p0 = scmp.ne.s32.totalorder %s554_s1, %s443_s16  ;;  %s18_s13 = int_to_ptr.vmem [resolvable:$true] %s17_s13 }
   0x3   :  { %p447_p1 = scmp.lt.u32.totalorder %s443_s16, %s554_s1 }
   0x5   :  { %p449_p2 = pnand %p447_p1, %p444_p0 }
   0x7   :  { %452 = shalt.err (!%p449_p2)
}
   0x8   :  { %s453_s21 = scalar_lea.vmem %s18_s13, 2048  ;;  %p458_p4 = scmp.lt.s32.totalorder %s18_s13, %s18_s13 }
   0x9   :  { %p454_p3 = scmp.ne.s32.totalorder %s18_s13, %s453_s21  ;;  %p459_p5 = scmp.lt.s32.totalorder %s453_s21, %s453_s21 }
   0xb   :  { %p460_p6 = por %p459_p5, %p458_p4 }
   0xd   :  { %p461_p7 = pnand %p460_p6, %p454_p3 }
   0xf   :  { %464 = shalt.err (!%p461_p7)
}
  0x10   :  { %s492_s22 = smov 128   ;;  %s493_s23 = smov 8  }
  0x11   :  { %23 = dma.hbm_to_vmem [thread:$0]  %s554_s1, 2048, %s18_s13, [#allocation4], %s492_s22, %s492_s22, %s493_s23  }
  0x12   :  { %s494_s26 = smov [#allocation5]   ;;  %s465_s30 = scalar_lea.hbm %s555_s2, 1024 }
  0x13   :  { %s29_s27 = sshll.u32 %s494_s26, 4  ;;  %p466_p8 = scmp.ne.s32.totalorder %s555_s2, %s465_s30  ;;  %s30_s27 = int_to_ptr.vmem [resolvable:$true] %s29_s27 }
  0x14   :  { %p469_p9 = scmp.lt.u32.totalorder %s465_s30, %s555_s2 }
  0x16   :  { %p471_p10 = pnand %p469_p9, %p466_p8 }
  0x18   :  { %474 = shalt.err (!%p471_p10)
}
  0x19   :  { %s475_s8 = scalar_lea.vmem %s30_s27, 1024  ;;  %p480_p12 = scmp.lt.s32.totalorder %s30_s27, %s30_s27 }
  0x1a   :  { %p476_p11 = scmp.ne.s32.totalorder %s30_s27, %s475_s8  ;;  %p481_p13 = scmp.lt.s32.totalorder %s475_s8, %s475_s8 }
  0x1c   :  { %p482_p0 = por %p481_p13, %p480_p12 }
  0x1e   :  { %p483_p1 = pnand %p482_p0, %p476_p11 }
  0x20   :  { %486 = shalt.err (!%p483_p1)
}
  0x21   :  { %s495_s1 = smov 64   ;;  %s496_s9 = smov 4  }
  0x22   :  { %35 = dma.hbm_to_vmem [thread:$0]  %s555_s2, 1024, %s30_s27, [#allocation6], %s495_s1, %s495_s1, %s496_s9  }
  0x23   :  { %487 = dma.done.wait [#allocation4], 2048  }
  0x24   :  { %488 = vsyncadd [#allocation4], 4294965248 }
  0x25   :  { %489 = dma.done.wait [#allocation6], 1024  }
  0x26   :  { %490 = vsyncadd [#allocation6], 4294966272  ;;  %v497_v0 = vmov 0   ;;  %v402_v1 = vld [vmem:[#allocation3 + $0x4] ss:$8 sps:$4 sm:$0xff]   ;;  %v498_v19 = vmov 0.0  }
  0x27   :  { %185 = vmatprep.mubr.bf16.mxu0 %v497_v0  ;;  %v404_v2 = vld [vmem:[#allocation3] ss:$8 sps:$4 sm:$0xff]   ;;  %153 = vmatprep.subr.bf16.mxu0 %v402_v1  ;;  %v405_v3 = vld [vmem:[#allocation3 + $0x14] ss:$8 sps:$4 sm:$0xff]   ;;  %v407_v4 = vld [vmem:[#allocation3 + $0x10] ss:$8 sps:$4 sm:$0xff]  }
  0x28   :  { %154 = vmatpush1.bf16.msra.mxu0 %v404_v2  ;;  %v408_v5 = vld [vmem:[#allocation3 + $0x24] ss:$8 sps:$4 sm:$0xff]   ;;  %v410_v6 = vld [vmem:[#allocation3 + $0x20] ss:$8 sps:$4 sm:$0xff]   ;;  %v411_v7 = vld [vmem:[#allocation3 + $0x34] ss:$8 sps:$4 sm:$0xff]   ;;  %373 = vmatprep.subr.bf16.mxu1 %v498_v19 }
  0x29   :  { %155 = vmatprep.subr.bf16.mxu0 %v405_v3  ;;  %v413_v8 = vld [vmem:[#allocation3 + $0x30] ss:$8 sps:$4 sm:$0xff]   ;;  %v414_v9 = vld [vmem:[#allocation3 + $0x44] ss:$8 sps:$4 sm:$0xff]   ;;  %v416_v10 = vld [vmem:[#allocation3 + $0x40] ss:$8 sps:$4 sm:$0xff]  }
  0x2a   :  { %v417_v11 = vld [vmem:[#allocation3 + $0x54] ss:$8 sps:$4 sm:$0xff]   ;;  %v419_v12 = vld [vmem:[#allocation3 + $0x50] ss:$8 sps:$4 sm:$0xff]   ;;  %v420_v13 = vld [vmem:[#allocation3 + $0x64] ss:$8 sps:$4 sm:$0xff]  }
  0x2b   :  { %v422_v14 = vld [vmem:[#allocation3 + $0x60] ss:$8 sps:$4 sm:$0xff]   ;;  %v423_v15 = vld [vmem:[#allocation3 + $0x74] ss:$8 sps:$4 sm:$0xff]   ;;  %v425_v16 = vld [vmem:[#allocation3 + $0x70] ss:$8 sps:$4 sm:$0xff]  }
  0x2c   :  { %156 = vmatpush1.bf16.msra.mxu0 %v407_v4  ;;  %v426_v17 = vld [vmem:[%s553_s0] sm:$0xff]   ;;  %v428_v20 = vld [vmem:[#allocation5 + $0x8] sm:$0xff]   ;;  %v429_v21 = vld [vmem:[#allocation5 + $0x10] sm:$0xff]   ;;  %vm499_vm0 = vmmov 0  }
  0x2d   :  { %157 = vmatprep.subr.bf16.mxu0 %v408_v5  ;;  %v427_v18 = vld [vmem:[#allocation5] sm:$0xff]   ;;  %v430_v22 = vld [vmem:[#allocation5 + $0x18] sm:$0xff]   ;;  %v432_v24 = vld [vmem:[#allocation5 + $0x28] sm:$0xff]   ;;  %389 = vmatprep.mubr.msk.bf16.mxu1 %vm499_vm0, %v498_v19 }
  0x2e   :  { %374 = vmatpush3.bf16.msra.mxu1 %v427_v18  ;;  %v431_v23 = vld [vmem:[#allocation5 + $0x20] sm:$0xff]   ;;  %v433_v25 = vld [vmem:[#allocation5 + $0x30] sm:$0xff]   ;;  %v434_v26 = vld [vmem:[#allocation5 + $0x38] sm:$0xff]  }
  0x2f   :  { %375 = vmatprep.subr.bf16.mxu1 %v498_v19 }
  0x30   :  { %158 = vmatpush1.bf16.msra.mxu0 %v410_v6 }
  0x31   :  { %159 = vmatprep.subr.bf16.mxu0 %v411_v7 }
  0x32   :  { %376 = vmatpush3.bf16.msra.mxu1 %v428_v20 }
  0x33   :  { %377 = vmatprep.subr.bf16.mxu1 %v498_v19 }
  0x34   :  { %160 = vmatpush1.bf16.msra.mxu0 %v413_v8 }
  0x35   :  { %161 = vmatprep.subr.bf16.mxu0 %v414_v9 }
  0x36   :  { %378 = vmatpush3.bf16.msra.mxu1 %v429_v21 }
  0x37   :  { %379 = vmatprep.subr.bf16.mxu1 %v498_v19 }
  0x38   :  { %162 = vmatpush1.bf16.msra.mxu0 %v416_v10 }
  0x39   :  { %163 = vmatprep.subr.bf16.mxu0 %v417_v11 }
  0x3a   :  { %380 = vmatpush3.bf16.msra.mxu1 %v430_v22 }
  0x3b   :  { %381 = vmatprep.subr.bf16.mxu1 %v498_v19 }
  0x3c   :  { %164 = vmatpush1.bf16.msra.mxu0 %v419_v12 }
  0x3d   :  { %165 = vmatprep.subr.bf16.mxu0 %v420_v13 }
  0x3e   :  { %382 = vmatpush3.bf16.msra.mxu1 %v431_v23 }
  0x3f   :  { %383 = vmatprep.subr.bf16.mxu1 %v498_v19 }
  0x40   :  { %166 = vmatpush1.bf16.msra.mxu0 %v422_v14 }
  0x41   :  { %167 = vmatprep.subr.bf16.mxu0 %v423_v15 }
  0x42   :  { %384 = vmatpush3.bf16.msra.mxu1 %v432_v24 }
  0x43   :  { %385 = vmatprep.subr.bf16.mxu1 %v498_v19 }
  0x44   :  { %168 = vmatpush1.bf16.msra.mxu0 %v425_v16 }
  0x46   :  { %386 = vmatpush3.bf16.msra.mxu1 %v433_v25 }
  0x47   :  { %186 = vmatmul.mubr.bf16.vlgmr.msra.gmra.mrb[0].mxu0 %v426_v17  ;;  %387 = vmatprep.subr.bf16.mxu1 %v498_v19 }
  0x4a   :  { %388 = vmatpush3.bf16.msra.mxu1 %v434_v26 }
 0x11a   :  { %v187_v27 = vpop.f32.mrb[0].mxu0 }
 0x11b   :  { %v354_v28 = vmul.f32 -1.442695, %v187_v27  ;;  %v189_v29 = vpop.f32.mrb[1].mxu0 }
 0x11c   :  { %v191_v30 = vpop.f32.mrb[2].mxu0 }
 0x11d   :  { %435 = vpow2.f32 %v354_v28  ;;  %v355_v31 = vmul.f32 -1.442695, %v191_v30  ;;  %v193_v32 = vpop.f32.mrb[3].mxu0 }
 0x11f   :  { %437 = vpow2.f32 %v355_v31 }
 0x127   :  { %v436_v33 = vpop.eup %435 }
 0x128   :  { %v202_v34 = vadd.f32 1.0, %v436_v33 }
 0x129   :  { %v438_v35 = vpop.eup %437 }
 0x12a   :  { %439 = vrcp.f32 %v202_v34  ;;  %v203_v36 = vadd.f32 1.0, %v438_v35 }
 0x12c   :  { %441 = vrcp.f32 %v203_v36 }
 0x134   :  { %v440_v37 = vpop.eup %439 }
 0x135   :  { %v208_v38 = vmul.f32 %v440_v37, %v187_v27 }
 0x136   :  { %v442_v39 = vpop.eup %441 }
 0x137   :  { %v210_v40 = vmul.f32 %v208_v38, %v189_v29  ;;  %v209_v41 = vmul.f32 %v442_v39, %v191_v30 }
 0x139   :  { %v211_v42 = vmul.f32 %v209_v41, %v193_v32 }
 0x13b   :  { %v214_v43 = vpack.c.bf16 %v211_v42, %v210_v40 }
 0x13d   :  { %390 = vmatmul.mubr.bf16.vlgmr.msra.gmra.mrb[0].mxu1 %v214_v43 }
 0x210   :  { %v313_v44 = vpop.f32.mrb[0].mxu1 }
 0x211   :  { %329 = vst [vmem:[%s556_s3] sm:$0xff] %v313_v44  ;;  %v391_v45 = vpop.f32.mrb[1].mxu1 }
 0x212   :  { %v316_v46 = vpop.f32.mrb[2].mxu1 }
 0x213   :  { %330 = vst [vmem:[%s556_s3 + $0x8] sm:$0xff] %v316_v46  ;;  %v392_v47 = vpop.f32.mrb[3].mxu1 }
 0x214   :  { %335 = vsyncpa [#allocation4], 1 }
 0x215   :  { %336 = vsyncpa [#allocation6], 1 }

</bundles_post_ra>
